<compile_context>
chip_gen: v6e
topology: v6e:2x2x1
jax: 0.10.0
libtpu: 0.0.40
codegen_flags: <defaults>
</compile_context>

<pallas_src>
import functools

import jax
import jax.numpy as jnp
from jax.experimental import pallas as pl
from jax.experimental.pallas import tpu as pltpu


_FUSED_MAX_ROWS = 2048          # max padded table rows for the one-hot fused path
_ONEHOT_VMEM_BUDGET = 8 << 20   # bytes allowed for the two in-kernel one-hot mats


def _round_up(x, m):
    return ((x + m - 1) // m) * m


def _num_tensorcores():
    """2 TensorCores per chip on v7x, 1 on v5e/v6e (heuristic via device_kind)."""
    try:
        kind = (jax.devices()[0].device_kind or "").lower()
    except Exception:
        return 1
    return 2 if "v7" in kind else 1


def _pick_tile(B, tile_b, *, n_cores, min_split_tile=1024):
    """Lane-dense batch tile: multiple of 128, as large as allowed.
    A 2-way split is attempted only when there are 2 TensorCores (v7x) and
    only when each half keeps >= min_split_tile lanes — on v5e/v6e a split is
    pure per-step overhead with zero parallelism gain."""
    b128 = _round_up(max(B, 1), 128)
    tb = max(128, (min(tile_b, b128) // 128) * 128)
    if n_cores >= 2 and b128 // tb < 2:
        half = ((b128 // 2) // 128) * 128
        if half >= min_split_tile:
            tb = half
    B_pad = _round_up(max(B, 1), tb)
    return tb, B_pad


# ---------------------------------------------------------------------------
# Fused path: tables resident in VMEM, in-kernel one-hot MXU gather.
# ---------------------------------------------------------------------------

def _mf_fused_kernel(ut_ref, it_ref, uidx_ref, iidx_ref, out_ref, *, normalize):
    nu = ut_ref.shape[1]
    ni = it_ref.shape[1]
    tb = out_ref.shape[1]
    # One-hot selection matrices, built on the VPU: [N_pad, tb].
    u_oh = (jax.lax.broadcasted_iota(jnp.int32, (nu, tb), 0)
            == uidx_ref[...]).astype(jnp.float32)
    i_oh = (jax.lax.broadcasted_iota(jnp.int32, (ni, tb), 0)
            == iidx_ref[...]).astype(jnp.float32)
    # MXU gathers straight into the lane-dense [F_ext, tb] layout.  HIGHEST
    # precision keeps f32 fidelity vs the f32 PyTorch module.
    u_e = jnp.dot(ut_ref[...], u_oh, preferred_element_type=jnp.float32,
                  precision=jax.lax.Precision.HIGHEST)
    i_e = jnp.dot(it_ref[...], i_oh, preferred_element_type=jnp.float32,
                  precision=jax.lax.Precision.HIGHEST)
    # Extended-factor reduction == <u, i> + u_bias + i_bias + global_bias.
    pred = jnp.sum(u_e * i_e, axis=0, keepdims=True)            # [1, tb]
    if normalize:
        pred = jax.nn.sigmoid(pred)
    out_ref[...] = pred.astype(out_ref.dtype)


def _build_ext_tables(u_emb, i_emb, u_bias, i_bias, global_bias):
    """Pack (embeddings, biases, global bias) into transposed extended tables.
    One-time, table-sized cost (independent of batch)."""
    n_users, F = u_emb.shape
    n_items = i_emb.shape[0]
    F_pad = _round_up(F + 3, 8)
    NU_pad = _round_up(n_users, 128)
    NI_pad = _round_up(n_items, 128)
    gb = jnp.reshape(global_bias, ()).astype(jnp.float32)

    ut = jnp.zeros((F_pad, NU_pad), jnp.float32)
    ut = ut.at[:F, :n_users].set(u_emb.T.astype(jnp.float32))
    ut = ut.at[F, :n_users].set(u_bias[:, 0].astype(jnp.float32))
    ut = ut.at[F + 1, :n_users].set(1.0)
    ut = ut.at[F + 2, :n_users].set(gb)

    it = jnp.zeros((F_pad, NI_pad), jnp.float32)
    it = it.at[:F, :n_items].set(i_emb.T.astype(jnp.float32))
    it = it.at[F, :n_items].set(1.0)
    it = it.at[F + 1, :n_items].set(i_bias[:, 0].astype(jnp.float32))
    it = it.at[F + 2, :n_items].set(1.0)
    return ut, it, F_pad, NU_pad, NI_pad


# ---------------------------------------------------------------------------
# Streaming fallback: wrapper gather (lane-dense) + elementwise kernel.
# ---------------------------------------------------------------------------

def _mf_streaming_kernel(u_e_ref, i_e_ref, b_ref, out_ref, *, normalize):
    pred = jnp.sum(u_e_ref[...] * i_e_ref[...], axis=0, keepdims=True) + b_ref[...]
    if normalize:
        pred = jax.nn.sigmoid(pred)
    out_ref[...] = pred.astype(out_ref.dtype)


def mf_forward_pallas(u_emb, i_emb, u_bias, i_bias, global_bias,
                      u_idx, i_idx, *, normalize=False, tile_b=8192,
                      force_streaming=False):
    """Pallas implementation of MatrixFactorization.forward (dim=1).

    NOTE: JAX-style gathers clamp out-of-range indices (PyTorch nn.Embedding
    raises).  Tables/compute stay f32 to match the PyTorch module's numerics;
    switching to bf16 tables would ~halve HBM traffic but changes numerics.
    """
    B = int(u_idx.shape[0])
    n_users, F = u_emb.shape
    n_items = i_emb.shape[0]
    NU_pad = _round_up(n_users, 128)
    NI_pad = _round_up(n_items, 128)
    n_cores = _num_tensorcores()

    use_fused = (not force_streaming) and max(NU_pad, NI_pad) <= _FUSED_MAX_ROWS

    if use_fused:
        # Cap the batch tile so both in-kernel one-hot matrices stay within a
        # modest VMEM budget: (NU_pad + NI_pad) * tb * 4 bytes.
        tb_cap = max(128, (_ONEHOT_VMEM_BUDGET // (4 * (NU_pad + NI_pad)))
                     // 128 * 128)
        tb, B_pad = _pick_tile(B, min(tile_b, tb_cap), n_cores=n_cores)
    else:
        tb, B_pad = _pick_tile(B, tile_b, n_cores=n_cores)

    # Pad the (tiny, int32) index vectors — never batch-sized gathered data.
    uidx_p = jnp.pad(u_idx.astype(jnp.int32), (0, B_pad - B)).reshape(1, B_pad)
    iidx_p = jnp.pad(i_idx.astype(jnp.int32), (0, B_pad - B)).reshape(1, B_pad)

    grid = (B_pad // tb,)
    cparams = pltpu.CompilerParams(dimension_semantics=("parallel",))

    if use_fused:
        ut, it, F_pad, NU_pad, NI_pad = _build_ext_tables(
            u_emb, i_emb, u_bias, i_bias, global_bias)
        out = pl.pallas_call(
            functools.partial(_mf_fused_kernel, normalize=normalize),
            out_shape=jax.ShapeDtypeStruct((1, B_pad), jnp.float32),
            grid=grid,
            in_specs=[
                pl.BlockSpec((F_pad, NU_pad), lambda i: (0, 0)),  # resident user table
                pl.BlockSpec((F_pad, NI_pad), lambda i: (0, 0)),  # resident item table
                pl.BlockSpec((1, tb), lambda i: (0, i)),          # user index tile
                pl.BlockSpec((1, tb), lambda i: (0, i)),          # item index tile
            ],
            out_specs=pl.BlockSpec((1, tb), lambda i: (0, i)),
            compiler_params=cparams,
        )(ut, it, uidx_p, iidx_p)
    else:
        # Streaming fallback: gather along axis=1 of pre-transposed tables so
        # the result is already lane-dense [F, B_pad] (no .T / jnp.pad passes
        # over batch-sized data); the three bias streams collapse to one row.
        # TODO(synk): fuse this gather in-kernel (scalar-prefetch indices +
        # double-buffered make_async_copy row gather) for production tables.
        u_e = jnp.take(u_emb.T.astype(jnp.float32), uidx_p[0], axis=1)
        i_e = jnp.take(i_emb.T.astype(jnp.float32), iidx_p[0], axis=1)
        bias = (jnp.take(u_bias[:, 0].astype(jnp.float32), uidx_p[0])
                + jnp.take(i_bias[:, 0].astype(jnp.float32), iidx_p[0])
                + jnp.reshape(global_bias, ()).astype(jnp.float32)
                ).reshape(1, B_pad)
        out = pl.pallas_call(
            functools.partial(_mf_streaming_kernel, normalize=normalize),
            out_shape=jax.ShapeDtypeStruct((1, B_pad), jnp.float32),
            grid=grid,
            in_specs=[
                pl.BlockSpec((F, tb), lambda i: (0, i)),
                pl.BlockSpec((F, tb), lambda i: (0, i)),
                pl.BlockSpec((1, tb), lambda i: (0, i)),
            ],
            out_specs=pl.BlockSpec((1, tb), lambda i: (0, i)),
            compiler_params=cparams,
        )(u_e, i_e, bias)

    return jnp.squeeze(out[0, :B])   # matches torch .squeeze(): () when B == 1


def init_params(key, n_users, n_items, n_factors):
    """Deterministic xavier-normal-style init matching the module's shapes."""
    k1, k2, k3, k4, k5 = jax.random.split(key, 5)

    def xavier_normal(k, shape):
        fan_out, fan_in = shape
        std = (2.0 / (fan_in + fan_out)) ** 0.5
        return std * jax.random.normal(k, shape, dtype=jnp.float32)

    u_emb = xavier_normal(k1, (n_users, n_factors))
    i_emb = xavier_normal(k2, (n_items, n_factors))
    u_bias = xavier_normal(k3, (n_users, 1))
    i_bias = xavier_normal(k4, (n_items, 1))
    global_bias = jax.random.uniform(k5, (1,), dtype=jnp.float32)   # torch.rand(1)
    return u_emb, i_emb, u_bias, i_bias, global_bias


def _reference(u_emb, i_emb, u_bias, i_bias, global_bias, u_idx, i_idx, normalize):
    ref = (jnp.sum(u_emb[u_idx] * i_emb[i_idx], axis=1, keepdims=True)
           + u_bias[u_idx] + i_bias[i_idx] + global_bias).squeeze()
    if normalize:
        ref = jax.nn.sigmoid(ref)
    return ref


if __name__ == "__main__":
    key = jax.random.PRNGKey(0)
    n_users, n_items, n_factors = 32, 48, 16
    params = init_params(key, n_users, n_items, n_factors)

    # batch=1: scalar squeeze; batch=10: single padded tile; batch=300: 384-lane tile
    for batch in (1, 10, 300):
        ku, ki = jax.random.split(jax.random.PRNGKey(batch))
        u_idx = jax.random.randint(ku, (batch,), 0, n_users)
        i_idx = jax.random.randint(ki, (batch,), 0, n_items)
        for normalize in (False, True):
            for force_streaming in (False, True):     # exercise both kernel paths
                pred = jax.block_until_ready(
                    mf_forward_pallas(*params, u_idx, i_idx,
                                      normalize=normalize,
                                      force_streaming=force_streaming))
                if bool(jnp.isnan(pred).any()):
                    raise RuntimeError("NaN detected in score computation")
                expected_shape = () if batch == 1 else (batch,)
                assert pred.shape == expected_shape, (pred.shape, expected_shape)
                ref = _reference(*params, u_idx, i_idx, normalize)
                assert jnp.allclose(pred, ref, atol=1e-5, rtol=1e-5), (
                    f"mismatch vs reference (batch={batch}, normalize={normalize}, "
                    f"streaming={force_streaming})")

    print("KERNEL_OK")
</pallas_src>

<mosaic_0001>
module attributes {stable_mosaic.version = 11 : i64} {
  func.func @_mf_fused_kernel(%arg0: i32, %arg1: memref<24x128xf32, #tpu.memory_space<vmem>>, %arg2: memref<24x128xf32, #tpu.memory_space<vmem>>, %arg3: memref<1x128xi32, #tpu.memory_space<vmem>>, %arg4: memref<1x128xi32, #tpu.memory_space<vmem>>, %arg5: memref<1x128xf32, #tpu.memory_space<vmem>>) attributes {dimension_semantics = [#tpu.dimension_semantics<parallel>], iteration_bounds = array<i64: 1>, scalar_prefetch = 0 : i64, scratch_operands = 0 : i64, tpu.core_type = #tpu.core_type<tc>, window_params = [{pipeline_mode = #tpu.pipeline_mode<synchronous>, transform_indices = @transform_0, window_bounds = array<i64: 24, 128>}, {pipeline_mode = #tpu.pipeline_mode<synchronous>, transform_indices = @transform_1, window_bounds = array<i64: 24, 128>}, {transform_indices = @transform_2, window_bounds = array<i64: 1, 128>}, {transform_indices = @transform_3, window_bounds = array<i64: 1, 128>}, {transform_indices = @transform_4, window_bounds = array<i64: 1, 128>}]} {
    %0 = tpu.iota {dimensions = array<i32: 0>} : vector<128x128xi32>
    %c0 = arith.constant 0 : index
    %c0_0 = arith.constant 0 : index
    %1 = vector.load %arg3[%c0, %c0_0] : memref<1x128xi32, #tpu.memory_space<vmem>>, vector<1x128xi32>
    %2 = vector.broadcast %1 : vector<1x128xi32> to vector<128x128xi32>
    %3 = arith.cmpi eq, %0, %2 : vector<128x128xi32>
    %4 = arith.extui %3 : vector<128x128xi1> to vector<128x128xi32>
    %5 = arith.sitofp %4 : vector<128x128xi32> to vector<128x128xf32>
    %6 = tpu.iota {dimensions = array<i32: 0>} : vector<128x128xi32>
    %c0_1 = arith.constant 0 : index
    %c0_2 = arith.constant 0 : index
    %7 = vector.load %arg4[%c0_1, %c0_2] : memref<1x128xi32, #tpu.memory_space<vmem>>, vector<1x128xi32>
    %8 = vector.broadcast %7 : vector<1x128xi32> to vector<128x128xi32>
    %9 = arith.cmpi eq, %6, %8 : vector<128x128xi32>
    %10 = arith.extui %9 : vector<128x128xi1> to vector<128x128xi32>
    %11 = arith.sitofp %10 : vector<128x128xi32> to vector<128x128xf32>
    %c0_3 = arith.constant 0 : index
    %c0_4 = arith.constant 0 : index
    %12 = vector.load %arg1[%c0_3, %c0_4] : memref<24x128xf32, #tpu.memory_space<vmem>>, vector<24x128xf32>
    %cst = arith.constant dense<0.000000e+00> : vector<24x128xf32>
    %13 = tpu.matmul %12, %5, %cst {dimension_numbers = #tpu.dot_dimension_numbers<[1], [0], [0], [1], [0, 0, 1, 1], [], []>, precision = #tpu.contract_precision<fp32>} : vector<24x128xf32>, vector<128x128xf32>, vector<24x128xf32> -> vector<24x128xf32>
    %c0_5 = arith.constant 0 : index
    %c0_6 = arith.constant 0 : index
    %14 = vector.load %arg2[%c0_5, %c0_6] : memref<24x128xf32, #tpu.memory_space<vmem>>, vector<24x128xf32>
    %cst_7 = arith.constant dense<0.000000e+00> : vector<24x128xf32>
    %15 = tpu.matmul %14, %11, %cst_7 {dimension_numbers = #tpu.dot_dimension_numbers<[1], [0], [0], [1], [0, 0, 1, 1], [], []>, precision = #tpu.contract_precision<fp32>} : vector<24x128xf32>, vector<128x128xf32>, vector<24x128xf32> -> vector<24x128xf32>
    %16 = arith.mulf %13, %15 : vector<24x128xf32>
    %cst_8 = arith.constant dense<0.000000e+00> : vector<128xf32>
    %17 = vector.multi_reduction <add>, %16, %cst_8 [0] : vector<24x128xf32> to vector<128xf32>
    %18 = vector.shape_cast %17 : vector<128xf32> to vector<1x128xf32>
    %c0_9 = arith.constant 0 : index
    %c0_10 = arith.constant 0 : index
    %19 = vector.load %arg5[%c0_9, %c0_10] : memref<1x128xf32, #tpu.memory_space<vmem>>, vector<1x128xf32>
    tpu.vector_store %arg5[%c0_9, %c0_10], %18 {strides = array<i32>} : memref<1x128xf32, #tpu.memory_space<vmem>>, vector<1x128xf32>,
    return
  }
  func.func @transform_0(%arg0: i32) -> (i32, i32) {
    %c0_i32 = arith.constant 0 : i32
    %c0_i32_0 = arith.constant 0 : i32
    %c0_i32_1 = arith.constant 0 : i32
    return %c0_i32, %c0_i32_0 : i32, i32
  }
  func.func @transform_1(%arg0: i32) -> (i32, i32) {
    %c0_i32 = arith.constant 0 : i32
    %c0_i32_0 = arith.constant 0 : i32
    %c0_i32_1 = arith.constant 0 : i32
    return %c0_i32, %c0_i32_0 : i32, i32
  }
  func.func @transform_2(%arg0: i32) -> (i32, i32) {
    %c0_i32 = arith.constant 0 : i32
    %c0_i32_0 = arith.constant 0 : i32
    return %c0_i32, %arg0 : i32, i32
  }
  func.func @transform_3(%arg0: i32) -> (i32, i32) {
    %c0_i32 = arith.constant 0 : i32
    %c0_i32_0 = arith.constant 0 : i32
    return %c0_i32, %arg0 : i32, i32
  }
  func.func @transform_4(%arg0: i32) -> (i32, i32) {
    %c0_i32 = arith.constant 0 : i32
    %c0_i32_0 = arith.constant 0 : i32
    return %c0_i32, %arg0 : i32, i32
  }
}

</mosaic_0001>

<bundles_post_ra>
// kernel: tpu_custom_call.1
= control target key start
LH: loop header
LB: loop body
LE: loop exit
PB: predicated region body
PF: predicated region fallthrough
CT: control target
= control target key end

     0   :  { %9 = vsyncpa [#allocation3], 0  ;;  %s3898_s0 = inlined_call_operand.hbm [shape: f32[24,128], index: 0, kind: input, shape index: {}]   ;;  %s3899_s1 = inlined_call_operand.hbm [shape: f32[24,128], index: 1, kind: input, shape index: {}]   ;;  %s3900_s2 = inlined_call_operand.vmem [shape: s32[1,128], index: 2, kind: input, shape index: {}]   ;;  %s3901_s3 = inlined_call_operand.vmem [shape: s32[1,128], index: 3, kind: input, shape index: {}]   ;;  %s3902_s4 = inlined_call_operand.hbm [shape: f32[1,128], index: 4, kind: output, shape index: {}]  }
   0x1   :  { %10 = vsyncpa [#allocation6], 0 }
   0x2   :  { %11 = vsyncpa [#allocation4], 0  ;;  %s2581_s15 = smov [#allocation2]  }
   0x3   :  { %s17_s16 = sshll.u32 %s2581_s15, 4  ;;  %s18_s16 = int_to_ptr.vmem [resolvable:$true] %s17_s16 }
   0x4   :  { %s2523_s17 = scalar_lea.vmem %s18_s16, 384  ;;  %p2528_p1 = scmp.lt.s32.totalorder %s18_s16, %s18_s16 }
   0x5   :  { %p2524_p0 = scmp.ne.s32.totalorder %s18_s16, %s2523_s17  ;;  %p2529_p2 = scmp.lt.s32.totalorder %s2523_s17, %s2523_s17 }
   0x7   :  { %p2530_p3 = por %p2529_p2, %p2528_p1 }
   0x9   :  { %p2531_p4 = pnand %p2530_p3, %p2524_p0 }
   0xb   :  { %2534 = shalt.err (!%p2531_p4)
}
   0xc   :  { %s2582_s18 = smov 128   ;;  %s2583_s19 = smov 8  }
   0xd   :  { %23 = dma.hbm_to_vmem [thread:$0]  %s3898_s0, 384, %s18_s16, [#allocation3], %s2582_s18, %s2582_s18, %s2583_s19  }
   0xe   :  { %s2584_s22 = smov [#allocation5]  }
   0xf   :  { %s29_s23 = sshll.u32 %s2584_s22, 4  ;;  %s30_s23 = int_to_ptr.vmem [resolvable:$true] %s29_s23 }
  0x10   :  { %s2543_s24 = scalar_lea.vmem %s30_s23, 384  ;;  %p2548_p6 = scmp.lt.s32.totalorder %s30_s23, %s30_s23 }
  0x11   :  { %p2544_p5 = scmp.ne.s32.totalorder %s30_s23, %s2543_s24  ;;  %p2549_p7 = scmp.lt.s32.totalorder %s2543_s24, %s2543_s24 }
  0x13   :  { %p2550_p8 = por %p2549_p7, %p2548_p6 }
  0x15   :  { %p2551_p9 = pnand %p2550_p8, %p2544_p5 }
  0x17   :  { %2554 = shalt.err (!%p2551_p9)
}
  0x18   :  { %35 = dma.hbm_to_vmem [thread:$0]  %s3899_s1, 384, %s30_s23, [#allocation6], %s2582_s18, %s2582_s18, %s2583_s19  }
  0x19   :  { %2575 = dma.done.wait [#allocation3], 384  }
  0x1a   :  { %2576 = vsyncadd [#allocation3], 4294966912 }
  0x1b   :  { %2577 = dma.done.wait [#allocation6], 384  }
  0x1c   :  { %2578 = vsyncadd [#allocation6], 4294966912  ;;  %v46_v0 = vlaneseq  ;;  %v2585_v1 = vmov 0.0   ;;  %vm2586_vm0 = vmmov 0   ;;  %v2646_v8 = vld [vmem:[%s3900_s2] ss:$0 sm:$0xff] }
  0x1d   :  { %2015 = vmatprep.subr.mxu0 %v2585_v1  ;;  %2056 = vmatprep.subr.mxu1 %v2585_v1  ;;  %v2587_v13 = vmov 1.0  }
  0x1e   :  { %v2622_v2 = vshrl.u32 %v46_v0, 7  ;;  %2047 = vmatprep.mubr.msk.f32.mxu0 %vm2586_vm0, %v2585_v1  ;;  %2088 = vmatprep.mubr.msk.f32.mxu1 %vm2586_vm0, %v2585_v1  ;;  %v169_v0 = vld [vmem:[#allocation2] sm:$0xff] }
  0x20   :  { %v2629_v3 = vadd.s32 120, %v2622_v2  ;;  %v2632_v4 = vadd.s32 112, %v2622_v2  ;;  %v2635_v5 = vadd.s32 104, %v2622_v2  ;;  %v2638_v6 = vadd.s32 96, %v2622_v2 }
  0x21   :  { %v2641_v7 = vadd.s32 88, %v2622_v2  ;;  %v2649_v9 = vadd.s32 80, %v2622_v2  ;;  %v2652_v10 = vadd.s32 72, %v2622_v2  ;;  %v2655_v11 = vadd.s32 64, %v2622_v2 }
  0x22   :  { %v2658_v12 = vadd.s32 56, %v2622_v2  ;;  %vm83_vm1 = vcmp.eq.s32.totalorder %v2629_v3, %v2646_v8  ;;  %vm82_vm2 = vcmp.eq.s32.totalorder %v2632_v4, %v2646_v8  ;;  %vm81_vm3 = vcmp.eq.s32.totalorder %v2635_v5, %v2646_v8 }
  0x23   :  { %vm80_vm4 = vcmp.eq.s32.totalorder %v2638_v6, %v2646_v8  ;;  %2016 = vmatpush3.msk.msra.mxu0 %vm83_vm1, %v2587_v13  ;;  %v1672_v14 = vsel %vm82_vm2, 1.0, %v2585_v1  ;;  %v1671_v15 = vsel %vm81_vm3, 1.0, %v2585_v1  ;;  %vm79_vm5 = vcmp.eq.s32.totalorder %v2641_v7, %v2646_v8 }
  0x24   :  { %v1670_v16 = vsel %vm80_vm4, 1.0, %v2585_v1  ;;  %2017 = vmatprep.subr.mxu0 %v2585_v1  ;;  %v2687_v17 = vsub.f32 %v1672_v14, %v1672_v14  ;;  %v2689_v18 = vsub.f32 %v1671_v15, %v1671_v15  ;;  %v1669_v20 = vsel %vm79_vm5, 1.0, %v2585_v1 }
  0x25   :  { %v2691_v19 = vsub.f32 %v1670_v16, %v1670_v16  ;;  %2018 = vmatpush3.msk.msra.mxu0 %vm82_vm2, %v2587_v13  ;;  %v2701_v21 = vsub.f32 %v1669_v20, %v1669_v20  ;;  %v1673_v22 = vsel %vm83_vm1, 1.0, %v2585_v1  ;;  %vm78_vm6 = vcmp.eq.s32.totalorder %v2649_v9, %v2646_v8 }
  0x26   :  { %vm77_vm7 = vcmp.eq.s32.totalorder %v2652_v10, %v2646_v8  ;;  %2019 = vmatprep.subr.mxu0 %v2585_v1  ;;  %v2712_v23 = vsub.f32 %v1673_v22, %v1673_v22  ;;  %v1668_v24 = vsel %vm78_vm6, 1.0, %v2585_v1  ;;  %v293_v25 = vand.u32 4294901760, %v2687_v17 }
  0x27   :  { %v1667_v26 = vsel %vm77_vm7, 1.0, %v2585_v1  ;;  %2020 = vmatpush3.msk.msra.mxu0 %vm81_vm3, %v2587_v13  ;;  %v2727_v27 = vsub.f32 %v1668_v24, %v1668_v24  ;;  %v300_v28 = vand.u32 4294901760, %v2689_v18  ;;  %vm3904_vm8 = vcmp.eq.s32.totalorder %v2655_v11, %v2646_v8 }
  0x28   :  { %v2733_v29 = vadd.s32 48, %v2622_v2  ;;  %2021 = vmatprep.subr.mxu0 %v2585_v1  ;;  %v286_v30 = vand.u32 4294901760, %v2712_v23  ;;  %v294_v31 = vsub.f32 %v2687_v17, %v293_v25  ;;  %v1666_v32 = vsel %vm3904_vm8, 1.0, %v2585_v1 }
  0x29   :  { %v307_v33 = vand.u32 4294901760, %v2691_v19  ;;  %2022 = vmatpush3.msk.msra.mxu0 %vm80_vm4, %v2587_v13  ;;  %v2749_v34 = vsub.f32 %v1667_v26, %v1667_v26  ;;  %vm75_vm9 = vcmp.eq.s32.totalorder %v2658_v12, %v2646_v8  ;;  %v2754_v35 = vadd.s32 40, %v2622_v2 }
  0x2a   :  { %2023 = vmatprep.subr.mxu0 %v2585_v1  ;;  %v287_v36 = vsub.f32 %v2712_v23, %v286_v30  ;;  %v301_v37 = vsub.f32 %v2689_v18, %v300_v28  ;;  %v314_v38 = vand.u32 4294901760, %v2701_v21  ;;  %v2765_v39 = vadd.s32 32, %v2622_v2 }
  0x2b   :  { %2024 = vmatpush3.msk.msra.mxu0 %vm79_vm5, %v2587_v13  ;;  %v2771_v40 = vsub.f32 %v1666_v32, %v1666_v32  ;;  %v1665_v41 = vsel %vm75_vm9, 1.0, %v2585_v1  ;;  %vm3903_vm10 = vcmp.eq.s32.totalorder %v2733_v29, %v2646_v8  ;;  %v2780_v42 = vadd.s32 24, %v2622_v2 }
  0x2c   :  { %2025 = vmatprep.subr.mxu0 %v2585_v1  ;;  %v288_v43 = vand.u32 4294901760, %v287_v36  ;;  %v295_v44 = vand.u32 4294901760, %v294_v31  ;;  %v308_v45 = vsub.f32 %v2691_v19, %v307_v33  ;;  %v321_v46 = vand.u32 4294901760, %v2727_v27 }
  0x2d   :  { %2026 = vmatpush3.msk.msra.mxu0 %vm78_vm6, %v2587_v13  ;;  %v1664_v47 = vsel %vm3903_vm10, 1.0, %v2585_v1  ;;  %vm73_vm11 = vcmp.eq.s32.totalorder %v2754_v35, %v2646_v8  ;;  %v328_v48 = vand.u32 4294901760, %v2749_v34  ;;  %v2799_v49 = vadd.s32 16, %v2622_v2 }
  0x2e   :  { %2057 = vmatpush3.msra.mxu1 %v288_v43  ;;  %2027 = vmatprep.subr.mxu0 %v2585_v1  ;;  %v302_v50 = vand.u32 4294901760, %v301_v37  ;;  %v2802_v51 = vsub.f32 %v1665_v41, %v1665_v41  ;;  %v315_v52 = vsub.f32 %v2701_v21, %v314_v38  ;;  %vm72_vm12 = vcmp.eq.s32.totalorder %v2765_v39, %v2646_v8 }
  0x2f   :  { %2058 = vmatprep.subr.mxu1 %v2585_v1  ;;  %2028 = vmatpush3.msk.msra.mxu0 %vm77_vm7, %v2587_v13  ;;  %v322_v53 = vsub.f32 %v2727_v27, %v321_v46  ;;  %v1663_v54 = vsel %vm73_vm11, 1.0, %v2585_v1  ;;  %v2822_v55 = vadd.s32 8, %v2622_v2  ;;  %v309_v56 = vand.u32 4294901760, %v308_v45 }
  0x30   :  { %2059 = vmatpush3.msra.mxu1 %v295_v44  ;;  %2029 = vmatprep.subr.mxu0 %v2585_v1  ;;  %v2825_v57 = vsub.f32 %v1664_v47, %v1664_v47  ;;  %v335_v58 = vand.u32 4294901760, %v2771_v40  ;;  %vm71_vm13 = vcmp.eq.s32.totalorder %v2780_v42, %v2646_v8  ;;  %v329_v59 = vsub.f32 %v2749_v34, %v328_v48 }
  0x31   :  { %2060 = vmatprep.subr.mxu1 %v2585_v1  ;;  %2030 = vmatpush3.msk.msra.mxu0 %vm3904_vm8, %v2587_v13  ;;  %v1662_v60 = vsel %vm72_vm12, 1.0, %v2585_v1  ;;  %v316_v61 = vand.u32 4294901760, %v315_v52  ;;  %v2843_v62 = vsub.f32 %v1663_v54, %v1663_v54  ;;  %v342_v63 = vand.u32 4294901760, %v2802_v51 }
  0x32   :  { %2061 = vmatpush3.msra.mxu1 %v302_v50  ;;  %2031 = vmatprep.subr.mxu0 %v2585_v1  ;;  %vm70_vm14 = vcmp.eq.s32.totalorder %v2799_v49, %v2646_v8  ;;  %v323_v14 = vand.u32 4294901760, %v322_v53  ;;  %v1661_v15 = vsel %vm71_vm13, 1.0, %v2585_v1  ;;  %v2858_v16 = vsub.f32 %v1662_v60, %v1662_v60 }
  0x33   :  { %2062 = vmatprep.subr.mxu1 %v2585_v1  ;;  %2032 = vmatpush3.msk.msra.mxu0 %vm75_vm9, %v2587_v13  ;;  %v336_v20 = vsub.f32 %v2771_v40, %v335_v58  ;;  %v349_v22 = vand.u32 4294901760, %v2825_v57  ;;  %vm69_vm15 = vcmp.eq.s32.totalorder %v2822_v55, %v2646_v8  ;;  %v330_v24 = vand.u32 4294901760, %v329_v59 }
  0x34   :  { %2063 = vmatpush3.msra.mxu1 %v309_v56  ;;  %2033 = vmatprep.subr.mxu0 %v2585_v1  ;;  %v1660_v26 = vsel %vm70_vm14, 1.0, %v2585_v1  ;;  %v2875_v31 = vand.u32 4294901760, %v169_v0  ;;  %v2878_v32 = vsub.f32 %v1661_v15, %v1661_v15  ;;  %v343_v36 = vsub.f32 %v2802_v51, %v342_v63 }
  0x35   :  { %2064 = vmatprep.subr.mxu1 %v2585_v1  ;;  %2034 = vmatpush3.msk.msra.mxu0 %vm3903_vm10, %v2587_v13  ;;  %v356_v37 = vand.u32 4294901760, %v2843_v62  ;;  %vm68_vm10 = vcmp.eq.s32.totalorder %v2622_v2, %v2646_v8  ;;  %v1659_v41 = vsel %vm69_vm15, 1.0, %v2585_v1  ;;  %v337_v44 = vand.u32 4294901760, %v336_v20 }
  0x36   :  { %2065 = vmatpush3.msra.mxu1 %v316_v61  ;;  %2035 = vmatprep.subr.mxu0 %v2585_v1  ;;  %v2896_v43 = vsub.f32 %v169_v0, %v2875_v31  ;;  %v2899_v45 = vsub.f32 %v1660_v26, %v1660_v26  ;;  %v350_v47 = vsub.f32 %v2825_v57, %v349_v22  ;;  %v363_v50 = vand.u32 4294901760, %v2858_v16 }
  0x37   :  { %2066 = vmatprep.subr.mxu1 %v2585_v1  ;;  %2036 = vmatpush3.msk.msra.mxu0 %vm73_vm11, %v2587_v13  ;;  %v1658_v52 = vsel %vm68_vm10, 1.0, %v2585_v1  ;;  %v344_v54 = vand.u32 4294901760, %v343_v36  ;;  %v2916_v56 = vsub.f32 %v1659_v41, %v1659_v41  ;;  %v357_v59 = vsub.f32 %v2843_v62, %v356_v37 }
  0x38   :  { %2067 = vmatpush3.msra.mxu1 %v323_v14  ;;  %2037 = vmatprep.subr.mxu0 %v2585_v1  ;;  %v255_v53 = vand.u32 4294901760, %v2896_v43  ;;  %v370_v60 = vand.u32 4294901760, %v2878_v32  ;;  %v351_v0 = vand.u32 4294901760, %v350_v47  ;;  %v2931_v14 = vsub.f32 %v1658_v52, %v1658_v52 }
  0x39   :  { %2068 = vmatprep.subr.mxu1 %v2585_v1  ;;  %2038 = vmatpush3.msk.msra.mxu0 %vm72_vm12, %v2587_v13  ;;  %v364_v15 = vsub.f32 %v2858_v16, %v363_v50  ;;  %v377_v20 = vand.u32 4294901760, %v2899_v45  ;;  %v384_v36 = vand.u32 4294901760, %v2916_v56 }
  0x3a   :  { %2069 = vmatpush3.msra.mxu1 %v330_v24  ;;  %2039 = vmatprep.subr.mxu0 %v2585_v1  ;;  %v256_v61 = vsub.f32 %v2896_v43, %v255_v53  ;;  %v358_v24 = vand.u32 4294901760, %v357_v59  ;;  %v371_v26 = vsub.f32 %v2878_v32, %v370_v60  ;;  %v391_v52 = vand.u32 4294901760, %v2931_v14 }
  0x3b   :  { %2070 = vmatprep.subr.mxu1 %v2585_v1  ;;  %2040 = vmatpush3.msk.msra.mxu0 %vm71_vm13, %v2587_v13  ;;  %v378_v47 = vsub.f32 %v2899_v45, %v377_v20  ;;  %v385_v59 = vsub.f32 %v2916_v56, %v384_v36 }
  0x3c   :  { %2071 = vmatpush3.msra.mxu1 %v337_v44  ;;  %2041 = vmatprep.subr.mxu0 %v2585_v1  ;;  %v257_v41 = vand.u32 4294901760, %v256_v61  ;;  %v365_v44 = vand.u32 4294901760, %v364_v15  ;;  %v170_v15 = vld [vmem:[#allocation2 + $0x8] sm:$0xff] }
  0x3d   :  { %2072 = vmatprep.subr.mxu1 %v2585_v1  ;;  %2042 = vmatpush3.msk.msra.mxu0 %vm70_vm14, %v2587_v13  ;;  %v379_v61 = vand.u32 4294901760, %v378_v47 }
  0x3e   :  { %2073 = vmatpush3.msra.mxu1 %v344_v54  ;;  %2043 = vmatprep.subr.mxu0 %v2585_v1  ;;  %v372_v54 = vand.u32 4294901760, %v371_v26 }
  0x3f   :  { %2074 = vmatprep.subr.mxu1 %v2585_v1  ;;  %2044 = vmatpush3.msk.msra.mxu0 %vm69_vm15, %v2587_v13 }
  0x40   :  { %2075 = vmatpush3.msra.mxu1 %v351_v0  ;;  %2045 = vmatprep.subr.mxu0 %v2585_v1  ;;  %v392_v0 = vsub.f32 %v2931_v14, %v391_v52 }
  0x41   :  { %2076 = vmatprep.subr.mxu1 %v2585_v1  ;;  %2046 = vmatpush3.msk.msra.mxu0 %vm68_vm10, %v2587_v13 }
  0x42   :  { %2077 = vmatpush3.msra.mxu1 %v358_v24  ;;  %2097 = vmatprep.subr.mxu0 %v2585_v1  ;;  %v386_v24 = vand.u32 4294901760, %v385_v59  ;;  %v393_v26 = vand.u32 4294901760, %v392_v0 }
  0x43   :  { %2078 = vmatprep.subr.mxu1 %v2585_v1  ;;  %2048 = vmatmul.mubr.f32.vlgmr.msra.gmra.mxu0 %v257_v41  ;;  %v2977_v41 = vand.u32 4294901760, %v170_v15 }
  0x44   :  { %2079 = vmatpush3.msra.mxu1 %v365_v44  ;;  %2098 = vmatpush3.msra.mxu0 %v2712_v23  ;;  %v171_v44 = vld [vmem:[#allocation2 + $0x10] sm:$0xff] }
  0x45   :  { %2080 = vmatprep.subr.mxu1 %v2585_v1  ;;  %2099 = vmatprep.subr.mxu0 %v2585_v1  ;;  %v2986_v47 = vsub.f32 %v170_v15, %v2977_v41 }
  0x46   :  { %2081 = vmatpush3.msra.mxu1 %v372_v54  ;;  %2100 = vmatpush3.msra.mxu0 %v2687_v17  ;;  %v2990_v54 = vand.u32 4294901760, %v171_v44  ;;  %v3202_v17 = vld [vmem:[%s3901_s3] ss:$0 sm:$0xff]  ;;  %s2588_s3 = smov [#allocation7]  }
  0x47   :  { %2082 = vmatprep.subr.mxu1 %v2585_v1  ;;  %2101 = vmatprep.subr.mxu0 %v2585_v1  ;;  %v265_v59 = vand.u32 4294901760, %v2986_v47  ;;  %s1647_s28 = sshll.u32 %s2588_s3, 4  ;;  %s1648_s28 = int_to_ptr.vmem [resolvable:$true] %s1647_s28 }
  0x48   :  { %2083 = vmatpush3.msra.mxu1 %v379_v61  ;;  %2102 = vmatpush3.msra.mxu0 %v2689_v18  ;;  %v3008_v61 = vsub.f32 %v171_v44, %v2990_v54  ;;  %s2555_s29 = scalar_lea.vmem %s1648_s28, 16  ;;  %s2559_s30 = scalar_lea.vmem %s1648_s28, 32 }
  0x49   :  { %2084 = vmatprep.subr.mxu1 %v2585_v1  ;;  %2103 = vmatprep.subr.mxu0 %v2585_v1  ;;  %v266_v0 = vsub.f32 %v2986_v47, %v265_v59  ;;  %p2556_p10 = scmp.ne.s32.totalorder %s1648_s28, %s2555_s29  ;;  %p2560_p11 = scmp.lt.s32.totalorder %s1648_s28, %s1648_s28 }
  0x4a   :  { %2085 = vmatpush3.msra.mxu1 %v386_v24  ;;  %2104 = vmatpush3.msra.mxu0 %v2691_v19  ;;  %v275_v15 = vand.u32 4294901760, %v3008_v61  ;;  %p2561_p12 = scmp.lt.s32.totalorder %s2559_s30, %s2555_s29 }
  0x4b   :  { %2086 = vmatprep.subr.mxu1 %v2585_v1  ;;  %2105 = vmatprep.subr.mxu0 %v2585_v1  ;;  %v267_v24 = vand.u32 4294901760, %v266_v0 }
  0x4c   :  { %2087 = vmatpush3.msra.mxu1 %v393_v26  ;;  %2106 = vmatpush3.msra.mxu0 %v2701_v21  ;;  %v276_v26 = vsub.f32 %v3008_v61, %v275_v15  ;;  %p2562_p13 = por %p2561_p12, %p2560_p11 }
  0x4d   :  { %2089 = vmatmul.mubr.f32.vlgmr.msra.gmra.mxu1 %v2875_v31  ;;  %2138 = vmatprep.subr.mxu1 %v2585_v1 }
  0x4e   :  { %2107 = vmatprep.subr.mxu0 %v2585_v1  ;;  %2139 = vmatpush3.msk.msra.mxu1 %vm83_vm1, %v2587_v13  ;;  %v277_v44 = vand.u32 4294901760, %v276_v26  ;;  %p2563_p0 = pnand %p2562_p13, %p2556_p10 }
  0x4f   :  { %2108 = vmatpush3.msra.mxu0 %v2727_v27  ;;  %2140 = vmatprep.subr.mxu1 %v2585_v1 }
  0x50   :  { %2109 = vmatprep.subr.mxu0 %v2585_v1  ;;  %2141 = vmatpush3.msk.msra.mxu1 %vm82_vm2, %v2587_v13 }
  0x51   :  { %2110 = vmatpush3.msra.mxu0 %v2749_v34  ;;  %2142 = vmatprep.subr.mxu1 %v2585_v1 }
  0x52   :  { %2111 = vmatprep.subr.mxu0 %v2585_v1  ;;  %2143 = vmatpush3.msk.msra.mxu1 %vm81_vm3, %v2587_v13 }
  0x53   :  { %2112 = vmatpush3.msra.mxu0 %v2771_v40  ;;  %2144 = vmatprep.subr.mxu1 %v2585_v1 }
  0x54   :  { %2113 = vmatprep.subr.mxu0 %v2585_v1  ;;  %2145 = vmatpush3.msk.msra.mxu1 %vm80_vm4, %v2587_v13 }
  0x55   :  { %2114 = vmatpush3.msra.mxu0 %v2802_v51  ;;  %2146 = vmatprep.subr.mxu1 %v2585_v1 }
  0x56   :  { %2115 = vmatprep.subr.mxu0 %v2585_v1  ;;  %2147 = vmatpush3.msk.msra.mxu1 %vm79_vm5, %v2587_v13 }
  0x57   :  { %2116 = vmatpush3.msra.mxu0 %v2825_v57  ;;  %2148 = vmatprep.subr.mxu1 %v2585_v1 }
  0x58   :  { %2117 = vmatprep.subr.mxu0 %v2585_v1  ;;  %2149 = vmatpush3.msk.msra.mxu1 %vm78_vm6, %v2587_v13 }
  0x59   :  { %2118 = vmatpush3.msra.mxu0 %v2843_v62  ;;  %2150 = vmatprep.subr.mxu1 %v2585_v1 }
  0x5a   :  { %2119 = vmatprep.subr.mxu0 %v2585_v1  ;;  %2151 = vmatpush3.msk.msra.mxu1 %vm77_vm7, %v2587_v13 }
  0x5b   :  { %2050 = vmatprep.mubr.msk.f32.mxu0 %vm2586_vm0, %v2585_v1  ;;  %2120 = vmatpush3.msra.mxu0 %v2858_v16 }
  0x5c   :  { %2152 = vmatprep.subr.mxu1 %v2585_v1  ;;  %2051 = vmatmul.mubr.f32.gmra.mxu0 %v267_v24 }
  0x5d   :  { %2121 = vmatprep.subr.mxu0 %v2585_v1  ;;  %2153 = vmatpush3.msk.msra.mxu1 %vm3904_vm8, %v2587_v13  ;;  %vm3907_vm8 = vcmp.eq.s32.totalorder %v2733_v29, %v2646_v8 }
  0x5e   :  { %2122 = vmatpush3.msra.mxu0 %v2878_v32  ;;  %2154 = vmatprep.subr.mxu1 %v2585_v1 }
  0x5f   :  { %2123 = vmatprep.subr.mxu0 %v2585_v1  ;;  %2155 = vmatpush3.msk.msra.mxu1 %vm75_vm9, %v2587_v13 }
  0x60   :  { %2053 = vmatprep.mubr.msk.f32.mxu0 %vm2586_vm0, %v2585_v1  ;;  %2124 = vmatpush3.msra.mxu0 %v2899_v45 }
  0x61   :  { %2156 = vmatprep.subr.mxu1 %v2585_v1  ;;  %2054 = vmatmul.mubr.f32.gmra.mxu0 %v277_v44 }
  0x62   :  { %2125 = vmatprep.subr.mxu0 %v2585_v1  ;;  %2157 = vmatpush3.msk.msra.mxu1 %vm3907_vm8, %v2587_v13 }
  0x63   :  { %2126 = vmatpush3.msra.mxu0 %v2916_v56  ;;  %2158 = vmatprep.subr.mxu1 %v2585_v1 }
  0x64   :  { %2127 = vmatprep.subr.mxu0 %v2585_v1  ;;  %2159 = vmatpush3.msk.msra.mxu1 %vm73_vm11, %v2587_v13 }
  0x65   :  { %2091 = vmatprep.mubr.msk.f32.mxu1 %vm2586_vm0, %v2585_v1  ;;  %2128 = vmatpush3.msra.mxu0 %v2931_v14 }
  0x66   :  { %2129 = vmatprep.mubr.msk.f32.mxu0 %vm2586_vm0, %v2585_v1  ;;  %2160 = vmatprep.subr.mxu1 %v2585_v1 }
  0x67   :  { %2092 = vmatmul.mubr.f32.gmra.mxu1 %v2977_v41  ;;  %2130 = vmatmul.mubr.f32.vlgmr.msra.gmra.mxu0 %v2896_v43 }
  0x68   :  { %2161 = vmatpush3.msk.msra.mxu1 %vm72_vm12, %v2587_v13  ;;  %2179 = vmatprep.subr.mxu0 %v2585_v1 }
  0x69   :  { %2162 = vmatprep.subr.mxu1 %v2585_v1  ;;  %2180 = vmatpush3.msra.mxu0 %v286_v30 }
  0x6a   :  { %2163 = vmatpush3.msk.msra.mxu1 %vm71_vm13, %v2587_v13  ;;  %2181 = vmatprep.subr.mxu0 %v2585_v1 }
  0x6b   :  { %2094 = vmatprep.mubr.msk.f32.mxu1 %vm2586_vm0, %v2585_v1  ;;  %2132 = vmatprep.mubr.msk.f32.mxu0 %vm2586_vm0, %v2585_v1 }
  0x6c   :  { %2164 = vmatprep.subr.mxu1 %v2585_v1  ;;  %2182 = vmatpush3.msra.mxu0 %v293_v25 }
  0x6d   :  { %2095 = vmatmul.mubr.f32.gmra.mxu1 %v2990_v54  ;;  %2133 = vmatmul.mubr.f32.gmra.mxu0 %v2986_v47 }
  0x6e   :  { %2165 = vmatpush3.msk.msra.mxu1 %vm70_vm14, %v2587_v13  ;;  %2183 = vmatprep.subr.mxu0 %v2585_v1 }
  0x6f   :  { %2166 = vmatprep.subr.mxu1 %v2585_v1  ;;  %2184 = vmatpush3.msra.mxu0 %v300_v28 }
  0x70   :  { %2167 = vmatpush3.msk.msra.mxu1 %vm69_vm15, %v2587_v13  ;;  %2185 = vmatprep.subr.mxu0 %v2585_v1 }
  0x71   :  { %2135 = vmatprep.mubr.msk.f32.mxu0 %vm2586_vm0, %v2585_v1  ;;  %2168 = vmatprep.subr.mxu1 %v2585_v1 }
  0x72   :  { %2186 = vmatpush3.msra.mxu0 %v307_v33  ;;  %2169 = vmatpush3.msk.msra.mxu1 %vm68_vm10, %v2587_v13 }
  0x73   :  { %2136 = vmatmul.mubr.f32.gmra.mxu0 %v3008_v61  ;;  %2170 = vmatprep.mubr.msk.f32.mxu1 %vm2586_vm0, %v2585_v1 }
  0x74   :  { %2187 = vmatprep.subr.mxu0 %v2585_v1  ;;  %2171 = vmatmul.mubr.f32.vlgmr.msra.gmra.mxu1 %v255_v53 }
  0x75   :  { %2188 = vmatpush3.msra.mxu0 %v314_v38  ;;  %2220 = vmatprep.subr.mxu1 %v2585_v1 }
  0x76   :  { %2189 = vmatprep.subr.mxu0 %v2585_v1  ;;  %2221 = vmatpush3.msk.msra.mxu1 %vm83_vm1, %v2587_v13  ;;  %vm3908_vm1 = vcmp.eq.s32.totalorder %v2655_v11, %v2646_v8 }
  0x77   :  { %2190 = vmatpush3.msra.mxu0 %v321_v46  ;;  %2222 = vmatprep.subr.mxu1 %v2585_v1 }
  0x78   :  { %2173 = vmatprep.mubr.msk.f32.mxu1 %vm2586_vm0, %v2585_v1  ;;  %2191 = vmatprep.subr.mxu0 %v2585_v1 }
  0x79   :  { %2223 = vmatpush3.msk.msra.mxu1 %vm82_vm2, %v2587_v13  ;;  %2192 = vmatpush3.msra.mxu0 %v328_v48  ;;  %vm136_vm2 = vcmp.eq.s32.totalorder %v2629_v3, %v3202_v17 }
  0x7a   :  { %2174 = vmatmul.mubr.f32.gmra.mxu1 %v265_v59  ;;  %2224 = vmatprep.subr.mxu1 %v2585_v1  ;;  %v1690_v18 = vsel %vm136_vm2, 1.0, %v2585_v1 }
  0x7b   :  { %2193 = vmatprep.subr.mxu0 %v2585_v1  ;;  %2225 = vmatpush3.msk.msra.mxu1 %vm81_vm3, %v2587_v13  ;;  %vm135_vm3 = vcmp.eq.s32.totalorder %v2632_v4, %v3202_v17  ;;  %v3251_v19 = vsub.f32 %v1690_v18, %v1690_v18 }
  0x7c   :  { %2194 = vmatpush3.msra.mxu0 %v335_v58  ;;  %2226 = vmatprep.subr.mxu1 %v2585_v1  ;;  %v1689_v21 = vsel %vm135_vm3, 1.0, %v2585_v1 }
  0x7d   :  { %2176 = vmatprep.mubr.msk.f32.mxu1 %vm2586_vm0, %v2585_v1  ;;  %2195 = vmatprep.subr.mxu0 %v2585_v1  ;;  %v3274_v25 = vsub.f32 %v1689_v21, %v1689_v21  ;;  %v1016_v27 = vand.u32 4294901760, %v3251_v19 }
  0x7e   :  { %2227 = vmatpush3.msk.msra.mxu1 %vm80_vm4, %v2587_v13  ;;  %2196 = vmatpush3.msra.mxu0 %v342_v63  ;;  %vm3909_vm4 = vmmov %vm3907_vm8  ;;  %vm131_vm8 = vcmp.eq.s32.totalorder %v2649_v9, %v3202_v17 }
  0x7f   :  { %2177 = vmatmul.mubr.f32.gmra.mxu1 %v275_v15  ;;  %2228 = vmatprep.subr.mxu1 %v2585_v1  ;;  %v1023_v34 = vand.u32 4294901760, %v3274_v25  ;;  %v1017_v40 = vsub.f32 %v3251_v19, %v1016_v27  ;;  %v1685_v46 = vsel %vm131_vm8, 1.0, %v2585_v1 }
  0x80   :  { %2197 = vmatprep.subr.mxu0 %v2585_v1  ;;  %2229 = vmatpush3.msk.msra.mxu1 %vm79_vm5, %v2587_v13  ;;  %vm134_vm5 = vcmp.eq.s32.totalorder %v2635_v5, %v3202_v17  ;;  %v3344_v57 = vsub.f32 %v1685_v46, %v1685_v46 }
  0x81   :  { %2198 = vmatpush3.msra.mxu0 %v349_v22  ;;  %2230 = vmatprep.subr.mxu1 %v2585_v1  ;;  %v1688_v23 = vsel %vm134_vm5, 1.0, %v2585_v1  ;;  %v1024_v58 = vsub.f32 %v3274_v25, %v1023_v34  ;;  %v1018_v63 = vand.u32 4294901760, %v1017_v40 }
  0x82   :  { %2199 = vmatprep.subr.mxu0 %v2585_v1  ;;  %2231 = vmatpush3.msk.msra.mxu1 %vm78_vm6, %v2587_v13  ;;  %vm133_vm6 = vcmp.eq.s32.totalorder %v2638_v6, %v3202_v17  ;;  %v3289_v28 = vsub.f32 %v1688_v23, %v1688_v23  ;;  %v1051_v56 = vand.u32 4294901760, %v3344_v57 }
  0x83   :  { %2200 = vmatpush3.msra.mxu0 %v356_v37  ;;  %2232 = vmatprep.subr.mxu1 %v2585_v1  ;;  %v1687_v30 = vsel %vm133_vm6, 1.0, %v2585_v1  ;;  %v1025_v43 = vand.u32 4294901760, %v1024_v58 }
  0x84   :  { %2201 = vmatprep.subr.mxu0 %v2585_v1  ;;  %2233 = vmatpush3.msk.msra.mxu1 %vm77_vm7, %v2587_v13  ;;  %vm132_vm7 = vcmp.eq.s32.totalorder %v2641_v7, %v3202_v17  ;;  %v3315_v38 = vsub.f32 %v1687_v30, %v1687_v30  ;;  %v1030_v48 = vand.u32 4294901760, %v3289_v28  ;;  %v1052_v0 = vsub.f32 %v3344_v57, %v1051_v56 }
  0x85   :  { %2202 = vmatpush3.msra.mxu0 %v363_v50  ;;  %2234 = vmatprep.subr.mxu1 %v2585_v1  ;;  %v1686_v33 = vsel %vm132_vm7, 1.0, %v2585_v1 }
  0x86   :  { %2203 = vmatprep.subr.mxu0 %v2585_v1  ;;  %2235 = vmatpush3.msk.msra.mxu1 %vm3908_vm1, %v2587_v13  ;;  %v3339_v51 = vsub.f32 %v1686_v33, %v1686_v33  ;;  %v1037_v22 = vand.u32 4294901760, %v3315_v38  ;;  %v1031_v8 = vsub.f32 %v3289_v28, %v1030_v48  ;;  %vm123_vm1 = vcmp.eq.s32.totalorder %v2799_v49, %v3202_v17 }
  0x87   :  { %2204 = vmatpush3.msra.mxu0 %v370_v60  ;;  %2236 = vmatprep.subr.mxu1 %v2585_v1  ;;  %v1053_v30 = vand.u32 4294901760, %v1052_v0 }
  0x88   :  { %2205 = vmatprep.subr.mxu0 %v2585_v1  ;;  %2237 = vmatpush3.msk.msra.mxu1 %vm75_vm9, %v2587_v13  ;;  %vm3906_vm9 = vcmp.eq.s32.totalorder %v2652_v10, %v3202_v17  ;;  %v1044_v37 = vand.u32 4294901760, %v3339_v51  ;;  %v1032_v60 = vand.u32 4294901760, %v1031_v8 }
  0x89   :  { %2206 = vmatpush3.msra.mxu0 %v377_v20  ;;  %2238 = vmatprep.subr.mxu1 %v2585_v1  ;;  %v1684_v62 = vsel %vm3906_vm9, 1.0, %v2585_v1 }
  0x8a   :  { %2207 = vmatprep.subr.mxu0 %v2585_v1  ;;  %2239 = vmatpush3.msk.msra.mxu1 %vm3909_vm4, %v2587_v13  ;;  %v3378_v32 = vsub.f32 %v1684_v62, %v1684_v62  ;;  %v1045_v20 = vsub.f32 %v3339_v51, %v1044_v37  ;;  %vm122_vm4 = vcmp.eq.s32.totalorder %v2822_v55, %v3202_v17 }
  0x8b   :  { %2208 = vmatpush3.msra.mxu0 %v384_v36  ;;  %2240 = vmatprep.subr.mxu1 %v2585_v1 }
  0x8c   :  { %2209 = vmatprep.subr.mxu0 %v2585_v1  ;;  %2241 = vmatpush3.msk.msra.mxu1 %vm73_vm11, %v2587_v13  ;;  %vm129_vm11 = vcmp.eq.s32.totalorder %v2655_v11, %v3202_v17  ;;  %v1058_v36 = vand.u32 4294901760, %v3378_v32  ;;  %v1046_v26 = vand.u32 4294901760, %v1045_v20 }
  0x8d   :  { %2210 = vmatpush3.msra.mxu0 %v391_v52  ;;  %2211 = vmatprep.mubr.msk.f32.mxu0 %vm2586_vm0, %v2585_v1  ;;  %v1683_v16 = vsel %vm129_vm11, 1.0, %v2585_v1  ;;  %v899_v52 = vld [vmem:[#allocation5] sm:$0xff] }
  0x8e   :  { %2242 = vmatprep.subr.mxu1 %v2585_v1  ;;  %2212 = vmatmul.mubr.f32.vlgmr.msra.gmra.mxu0 %v2875_v31  ;;  %v3386_v45 = vsub.f32 %v1683_v16, %v1683_v16  ;;  %v1059_v18 = vsub.f32 %v3378_v32, %v1058_v36 }
  0x8f   :  { %2243 = vmatpush3.msk.msra.mxu1 %vm72_vm12, %v2587_v13  ;;  %2261 = vmatprep.subr.mxu0 %v2585_v1  ;;  %vm3905_vm12 = vcmp.eq.s32.totalorder %v2658_v12, %v3202_v17 }
  0x90   :  { %2244 = vmatprep.subr.mxu1 %v2585_v1  ;;  %2262 = vmatpush3.msk.msra.mxu0 %vm136_vm2, %v2587_v13  ;;  %v1682_v50 = vsel %vm3905_vm12, 1.0, %v2585_v1  ;;  %v1065_v24 = vand.u32 4294901760, %v3386_v45  ;;  %v1060_v62 = vand.u32 4294901760, %v1059_v18 }
  0x91   :  { %2245 = vmatpush3.msk.msra.mxu1 %vm71_vm13, %v2587_v13  ;;  %2263 = vmatprep.subr.mxu0 %v2585_v1  ;;  %vm126_vm13 = vcmp.eq.s32.totalorder %v2754_v35, %v3202_v17  ;;  %v3413_v14 = vsub.f32 %v1682_v50, %v1682_v50 }
  0x92   :  { %2214 = vmatprep.mubr.msk.f32.mxu0 %vm2586_vm0, %v2585_v1  ;;  %2246 = vmatprep.subr.mxu1 %v2585_v1  ;;  %v1680_v59 = vsel %vm126_vm13, 1.0, %v2585_v1  ;;  %v1066_v33 = vsub.f32 %v3386_v45, %v1065_v24 }
  0x93   :  { %2264 = vmatpush3.msk.msra.mxu0 %vm135_vm3, %v2587_v13  ;;  %2247 = vmatpush3.msk.msra.mxu1 %vm70_vm14, %v2587_v13  ;;  %vm125_vm14 = vcmp.eq.s32.totalorder %v2765_v39, %v3202_v17  ;;  %v3449_v44 = vsub.f32 %v1680_v59, %v1680_v59  ;;  %v1072_v21 = vand.u32 4294901760, %v3413_v14 }
  0x94   :  { %2215 = vmatmul.mubr.f32.gmra.mxu0 %v2977_v41  ;;  %2265 = vmatprep.subr.mxu0 %v2585_v1  ;;  %v1679_v15 = vsel %vm125_vm14, 1.0, %v2585_v1 }
  0x95   :  { %2248 = vmatprep.subr.mxu1 %v2585_v1  ;;  %2266 = vmatpush3.msk.msra.mxu0 %vm134_vm5, %v2587_v13  ;;  %v3458_v23 = vsub.f32 %v1679_v15, %v1679_v15  ;;  %v1086_v16 = vand.u32 4294901760, %v3449_v44 }
  0x96   :  { %2249 = vmatpush3.msk.msra.mxu1 %vm69_vm15, %v2587_v13  ;;  %2267 = vmatprep.subr.mxu0 %v2585_v1  ;;  %vm124_vm15 = vcmp.eq.s32.totalorder %v2780_v42, %v3202_v17 }
  0x97   :  { %2217 = vmatprep.mubr.msk.f32.mxu0 %vm2586_vm0, %v2585_v1  ;;  %2250 = vmatprep.subr.mxu1 %v2585_v1  ;;  %v1678_v40 = vsel %vm124_vm15, 1.0, %v2585_v1  ;;  %v1087_v59 = vsub.f32 %v3449_v44, %v1086_v16 }
  0x98   :  { %2268 = vmatpush3.msk.msra.mxu0 %vm133_vm6, %v2587_v13  ;;  %2251 = vmatpush3.msk.msra.mxu1 %vm68_vm10, %v2587_v13  ;;  %vm127_vm10 = vcmp.eq.s32.totalorder %v2733_v29, %v3202_v17  ;;  %v3495_v8 = vsub.f32 %v1678_v40, %v1678_v40 }
  0x99   :  { %2218 = vmatmul.mubr.f32.gmra.mxu0 %v2990_v54  ;;  %2252 = vmatprep.mubr.msk.f32.mxu1 %vm2586_vm0, %v2585_v1  ;;  %v1681_v53 = vsel %vm127_vm10, 1.0, %v2585_v1 }
  0x9a   :  { %2269 = vmatprep.subr.mxu0 %v2585_v1  ;;  %2253 = vmatmul.mubr.f32.vlgmr.msra.gmra.mxu1 %v2875_v31  ;;  %v1038_v31 = vsub.f32 %v3315_v38, %v1037_v22  ;;  %v3423_v47 = vsub.f32 %v1681_v53, %v1681_v53  ;;  %v1093_v53 = vand.u32 4294901760, %v3458_v23  ;;  %v1100_v15 = vand.u32 4294901760, %v3495_v8 }
  0x9b   :  { %2270 = vmatpush3.msk.msra.mxu0 %vm132_vm7, %v2587_v13  ;;  %2302 = vmatprep.subr.mxu1 %v2585_v1 }
  0x9c   :  { %2271 = vmatprep.subr.mxu0 %v2585_v1  ;;  %2303 = vmatpush3.msra.mxu1 %v1018_v63  ;;  %v1039_v61 = vand.u32 4294901760, %v1038_v31  ;;  %v1079_v46 = vand.u32 4294901760, %v3423_v47  ;;  %v1073_v63 = vsub.f32 %v3413_v14, %v1072_v21  ;;  %v1676_v31 = vsel %vm122_vm4, 1.0, %v2585_v1 }
  0x9d   :  { %2272 = vmatpush3.msk.msra.mxu0 %vm131_vm8, %v2587_v13  ;;  %2304 = vmatprep.subr.mxu1 %v2585_v1  ;;  %v3529_v0 = vsub.f32 %v1676_v31, %v1676_v31  ;;  %v1094_v18 = vsub.f32 %v3458_v23, %v1093_v53 }
  0x9e   :  { %2255 = vmatprep.mubr.msk.f32.mxu1 %vm2586_vm0, %v2585_v1  ;;  %2273 = vmatprep.subr.mxu0 %v2585_v1  ;;  %v1080_v50 = vsub.f32 %v3423_v47, %v1079_v46 }
  0x9f   :  { %2305 = vmatpush3.msra.mxu1 %v1025_v43  ;;  %2274 = vmatpush3.msk.msra.mxu0 %vm3906_vm9, %v2587_v13  ;;  %v1067_v43 = vand.u32 4294901760, %v1066_v33 }
  0xa0   :  { %2256 = vmatmul.mubr.f32.gmra.mxu1 %v2977_v41  ;;  %2306 = vmatprep.subr.mxu1 %v2585_v1  ;;  %v3442_v41 = vand.u32 4294901760, %v899_v52 }
  0xa1   :  { %2275 = vmatprep.subr.mxu0 %v2585_v1  ;;  %2307 = vmatpush3.msra.mxu1 %v1032_v60 }
  0xa2   :  { %2276 = vmatpush3.msk.msra.mxu0 %vm129_vm11, %v2587_v13  ;;  %2308 = vmatprep.subr.mxu1 %v2585_v1  ;;  %v3479_v58 = vsub.f32 %v899_v52, %v3442_v41  ;;  %v1074_v52 = vand.u32 4294901760, %v1073_v63  ;;  %v1101_v63 = vsub.f32 %v3495_v8, %v1100_v15 }
  0xa3   :  { %2258 = vmatprep.mubr.msk.f32.mxu1 %vm2586_vm0, %v2585_v1  ;;  %2277 = vmatprep.subr.mxu0 %v2585_v1 }
  0xa4   :  { %2309 = vmatpush3.msra.mxu1 %v1039_v61  ;;  %2278 = vmatpush3.msk.msra.mxu0 %vm3905_vm12, %v2587_v13  ;;  %vm121_vm12 = vcmp.eq.s32.totalorder %v2622_v2, %v3202_v17  ;;  %v985_v20 = vand.u32 4294901760, %v3479_v58 }
  0xa5   :  { %2259 = vmatmul.mubr.f32.gmra.mxu1 %v2990_v54  ;;  %2310 = vmatprep.subr.mxu1 %v2585_v1  ;;  %v1677_v54 = vsel %vm123_vm1, 1.0, %v2585_v1  ;;  %v1675_v61 = vsel %vm121_vm12, 1.0, %v2585_v1 }
  0xa6   :  { %2279 = vmatprep.subr.mxu0 %v2585_v1  ;;  %2311 = vmatpush3.msra.mxu1 %v1046_v26  ;;  %v3513_v60 = vsub.f32 %v1677_v54, %v1677_v54  ;;  %v1081_v26 = vand.u32 4294901760, %v1080_v50  ;;  %v986_v33 = vsub.f32 %v3479_v58, %v985_v20  ;;  %v1114_v54 = vand.u32 4294901760, %v3529_v0 }
  0xa7   :  { %2280 = vmatpush3.msk.msra.mxu0 %vm127_vm10, %v2587_v13  ;;  %2312 = vmatprep.subr.mxu1 %v2585_v1 }
  0xa8   :  { %2281 = vmatprep.subr.mxu0 %v2585_v1  ;;  %2313 = vmatpush3.msra.mxu1 %v1053_v30  ;;  %v3541_v30 = vsub.f32 %v1675_v61, %v1675_v61  ;;  %v1107_v40 = vand.u32 4294901760, %v3513_v60  ;;  %v987_v50 = vand.u32 4294901760, %v986_v33  ;;  %v1115_v61 = vsub.f32 %v3529_v0, %v1114_v54 }
  0xa9   :  { %2282 = vmatpush3.msk.msra.mxu0 %vm126_vm13, %v2587_v13  ;;  %2314 = vmatprep.subr.mxu1 %v2585_v1 }
  0xaa   :  { %2283 = vmatprep.subr.mxu0 %v2585_v1  ;;  %2315 = vmatpush3.msra.mxu1 %v1060_v62  ;;  %v1088_v62 = vand.u32 4294901760, %v1087_v59  ;;  %v1108_v31 = vsub.f32 %v3513_v60, %v1107_v40  ;;  %v1102_v59 = vand.u32 4294901760, %v1101_v63  ;;  %v1116_v33 = vand.u32 4294901760, %v1115_v61 }
  0xab   :  { %2284 = vmatpush3.msk.msra.mxu0 %vm125_vm14, %v2587_v13  ;;  %2316 = vmatprep.subr.mxu1 %v2585_v1 }
  0xac   :  { %2285 = vmatprep.subr.mxu0 %v2585_v1  ;;  %2317 = vmatpush3.msra.mxu1 %v1067_v43  ;;  %v1095_v43 = vand.u32 4294901760, %v1094_v18 }
  0xad   :  { %2286 = vmatpush3.msk.msra.mxu0 %vm124_vm15, %v2587_v13  ;;  %2318 = vmatprep.subr.mxu1 %v2585_v1 }
  0xae   :  { %2287 = vmatprep.subr.mxu0 %v2585_v1  ;;  %2319 = vmatpush3.msra.mxu1 %v1074_v52  ;;  %v1121_v52 = vand.u32 4294901760, %v3541_v30 }
  0xaf   :  { %2288 = vmatpush3.msk.msra.mxu0 %vm123_vm1, %v2587_v13  ;;  %2320 = vmatprep.subr.mxu1 %v2585_v1 }
  0xb0   :  { %2289 = vmatprep.subr.mxu0 %v2585_v1  ;;  %2321 = vmatpush3.msra.mxu1 %v1081_v26  ;;  %v1109_v26 = vand.u32 4294901760, %v1108_v31  ;;  %v1122_v18 = vsub.f32 %v3541_v30, %v1121_v52 }
  0xb1   :  { %2290 = vmatpush3.msk.msra.mxu0 %vm122_vm4, %v2587_v13  ;;  %2322 = vmatprep.subr.mxu1 %v2585_v1 }
  0xb2   :  { %2291 = vmatprep.subr.mxu0 %v2585_v1  ;;  %2323 = vmatpush3.msra.mxu1 %v1088_v62  ;;  %v900_v62 = vld [vmem:[#allocation5 + $0x8] sm:$0xff]  ;;  %v1123_v63 = vand.u32 4294901760, %v1122_v18 }
  0xb3   :  { %2292 = vmatpush3.msk.msra.mxu0 %vm121_vm12, %v2587_v13  ;;  %2324 = vmatprep.subr.mxu1 %v2585_v1 }
  0xb4   :  { %2293 = vmatprep.mubr.msk.f32.mxu0 %vm2586_vm0, %v2585_v1  ;;  %2325 = vmatpush3.msra.mxu1 %v1095_v43  ;;  %v3590_v43 = vand.u32 4294901760, %v900_v62 }
  0xb5   :  { %2343 = vmatprep.subr.mxu0 %v2585_v1  ;;  %2294 = vmatmul.mubr.f32.vlgmr.msra.gmra.mxu0 %v987_v50  ;;  %v901_v50 = vld [vmem:[#allocation5 + $0x10] sm:$0xff] }
  0xb6   :  { %2326 = vmatprep.subr.mxu1 %v2585_v1  ;;  %2344 = vmatpush3.msra.mxu0 %v3251_v19  ;;  %v3600_v31 = vsub.f32 %v900_v62, %v3590_v43 }
  0xb7   :  { %2327 = vmatpush3.msra.mxu1 %v1102_v59  ;;  %2345 = vmatprep.subr.mxu0 %v2585_v1  ;;  %v3604_v59 = vand.u32 4294901760, %v901_v50 }
  0xb8   :  { %2328 = vmatprep.subr.mxu1 %v2585_v1  ;;  %2346 = vmatpush3.msra.mxu0 %v3274_v25  ;;  %v995_v61 = vand.u32 4294901760, %v3600_v31 }
  0xb9   :  { %2329 = vmatpush3.msra.mxu1 %v1109_v26  ;;  %2347 = vmatprep.subr.mxu0 %v2585_v1  ;;  %v3622_v26 = vsub.f32 %v901_v50, %v3604_v59 }
  0xba   :  { %2330 = vmatprep.subr.mxu1 %v2585_v1  ;;  %2348 = vmatpush3.msra.mxu0 %v3289_v28  ;;  %v996_v18 = vsub.f32 %v3600_v31, %v995_v61 }
  0xbb   :  { %2331 = vmatpush3.msra.mxu1 %v1116_v33  ;;  %2349 = vmatprep.subr.mxu0 %v2585_v1  ;;  %v1005_v33 = vand.u32 4294901760, %v3622_v26 }
  0xbc   :  { %2332 = vmatprep.subr.mxu1 %v2585_v1  ;;  %2350 = vmatpush3.msra.mxu0 %v3315_v38  ;;  %v997_v62 = vand.u32 4294901760, %v996_v18 }
  0xbd   :  { %2333 = vmatpush3.msra.mxu1 %v1123_v63  ;;  %2334 = vmatprep.mubr.msk.f32.mxu1 %vm2586_vm0, %v2585_v1  ;;  %v1006_v63 = vsub.f32 %v3622_v26, %v1005_v33 }
  0xbe   :  { %2351 = vmatprep.subr.mxu0 %v2585_v1  ;;  %2335 = vmatmul.mubr.f32.vlgmr.msra.gmra.mxu1 %v3442_v41 }
  0xbf   :  { %2352 = vmatpush3.msra.mxu0 %v3339_v51  ;;  %2384 = vmatprep.subr.mxu1 %v2585_v1  ;;  %v1007_v50 = vand.u32 4294901760, %v1006_v63 }
  0xc0   :  { %2353 = vmatprep.subr.mxu0 %v2585_v1  ;;  %2385 = vmatpush3.msk.msra.mxu1 %vm136_vm2, %v2587_v13 }
  0xc1   :  { %2354 = vmatpush3.msra.mxu0 %v3344_v57  ;;  %2386 = vmatprep.subr.mxu1 %v2585_v1 }
  0xc2   :  { %2355 = vmatprep.subr.mxu0 %v2585_v1  ;;  %2387 = vmatpush3.msk.msra.mxu1 %vm135_vm3, %v2587_v13 }
  0xc3   :  { %2356 = vmatpush3.msra.mxu0 %v3378_v32  ;;  %2388 = vmatprep.subr.mxu1 %v2585_v1 }
  0xc4   :  { %2357 = vmatprep.subr.mxu0 %v2585_v1  ;;  %2389 = vmatpush3.msk.msra.mxu1 %vm134_vm5, %v2587_v13 }
  0xc5   :  { %2358 = vmatpush3.msra.mxu0 %v3386_v45  ;;  %2390 = vmatprep.subr.mxu1 %v2585_v1 }
  0xc6   :  { %2359 = vmatprep.subr.mxu0 %v2585_v1  ;;  %2391 = vmatpush3.msk.msra.mxu1 %vm133_vm6, %v2587_v13 }
  0xc7   :  { %2360 = vmatpush3.msra.mxu0 %v3413_v14  ;;  %2392 = vmatprep.subr.mxu1 %v2585_v1 }
  0xc8   :  { %2361 = vmatprep.subr.mxu0 %v2585_v1  ;;  %2393 = vmatpush3.msk.msra.mxu1 %vm132_vm7, %v2587_v13 }
  0xc9   :  { %2362 = vmatpush3.msra.mxu0 %v3423_v47  ;;  %2394 = vmatprep.subr.mxu1 %v2585_v1 }
  0xca   :  { %2363 = vmatprep.subr.mxu0 %v2585_v1  ;;  %2395 = vmatpush3.msk.msra.mxu1 %vm131_vm8, %v2587_v13 }
  0xcb   :  { %2364 = vmatpush3.msra.mxu0 %v3449_v44  ;;  %2396 = vmatprep.subr.mxu1 %v2585_v1 }
  0xcc   :  { %2365 = vmatprep.subr.mxu0 %v2585_v1  ;;  %2397 = vmatpush3.msk.msra.mxu1 %vm3906_vm9, %v2587_v13  ;;  %vm3910_vm9 = vcmp.eq.s32.totalorder %v2658_v12, %v3202_v17 }
  0xcd   :  { %2296 = vmatprep.mubr.msk.f32.mxu0 %vm2586_vm0, %v2585_v1  ;;  %2366 = vmatpush3.msra.mxu0 %v3458_v23 }
  0xce   :  { %2398 = vmatprep.subr.mxu1 %v2585_v1  ;;  %2297 = vmatmul.mubr.f32.gmra.mxu0 %v997_v62 }
  0xcf   :  { %2367 = vmatprep.subr.mxu0 %v2585_v1  ;;  %2399 = vmatpush3.msk.msra.mxu1 %vm129_vm11, %v2587_v13 }
  0xd0   :  { %2368 = vmatpush3.msra.mxu0 %v3495_v8  ;;  %2400 = vmatprep.subr.mxu1 %v2585_v1 }
  0xd1   :  { %2369 = vmatprep.subr.mxu0 %v2585_v1  ;;  %2401 = vmatpush3.msk.msra.mxu1 %vm3910_vm9, %v2587_v13 }
  0xd2   :  { %2299 = vmatprep.mubr.msk.f32.mxu0 %vm2586_vm0, %v2585_v1  ;;  %2370 = vmatpush3.msra.mxu0 %v3513_v60 }
  0xd3   :  { %2402 = vmatprep.subr.mxu1 %v2585_v1  ;;  %2300 = vmatmul.mubr.f32.gmra.mxu0 %v1007_v50 }
  0xd4   :  { %2371 = vmatprep.subr.mxu0 %v2585_v1  ;;  %2403 = vmatpush3.msk.msra.mxu1 %vm127_vm10, %v2587_v13 }
  0xd5   :  { %2372 = vmatpush3.msra.mxu0 %v3529_v0  ;;  %2404 = vmatprep.subr.mxu1 %v2585_v1 }
  0xd6   :  { %2373 = vmatprep.subr.mxu0 %v2585_v1  ;;  %2405 = vmatpush3.msk.msra.mxu1 %vm126_vm13, %v2587_v13 }
  0xd7   :  { %2337 = vmatprep.mubr.msk.f32.mxu1 %vm2586_vm0, %v2585_v1  ;;  %2374 = vmatpush3.msra.mxu0 %v3541_v30 }
  0xd8   :  { %2375 = vmatprep.mubr.msk.f32.mxu0 %vm2586_vm0, %v2585_v1  ;;  %2406 = vmatprep.subr.mxu1 %v2585_v1 }
  0xd9   :  { %2338 = vmatmul.mubr.f32.gmra.mxu1 %v3590_v43  ;;  %2376 = vmatmul.mubr.f32.vlgmr.msra.gmra.mxu0 %v3479_v58 }
  0xda   :  { %2407 = vmatpush3.msk.msra.mxu1 %vm125_vm14, %v2587_v13  ;;  %2425 = vmatprep.subr.mxu0 %v2585_v1 }
  0xdb   :  { %2408 = vmatprep.subr.mxu1 %v2585_v1  ;;  %2426 = vmatpush3.msra.mxu0 %v1016_v27 }
  0xdc   :  { %2409 = vmatpush3.msk.msra.mxu1 %vm124_vm15, %v2587_v13  ;;  %2427 = vmatprep.subr.mxu0 %v2585_v1 }
  0xdd   :  { %2340 = vmatprep.mubr.msk.f32.mxu1 %vm2586_vm0, %v2585_v1  ;;  %2378 = vmatprep.mubr.msk.f32.mxu0 %vm2586_vm0, %v2585_v1 }
  0xde   :  { %2410 = vmatprep.subr.mxu1 %v2585_v1  ;;  %2428 = vmatpush3.msra.mxu0 %v1023_v34 }
  0xdf   :  { %2341 = vmatmul.mubr.f32.gmra.mxu1 %v3604_v59  ;;  %2379 = vmatmul.mubr.f32.gmra.mxu0 %v3600_v31 }
  0xe0   :  { %2411 = vmatpush3.msk.msra.mxu1 %vm123_vm1, %v2587_v13  ;;  %2429 = vmatprep.subr.mxu0 %v2585_v1 }
  0xe1   :  { %2412 = vmatprep.subr.mxu1 %v2585_v1  ;;  %2430 = vmatpush3.msra.mxu0 %v1030_v48 }
  0xe2   :  { %2413 = vmatpush3.msk.msra.mxu1 %vm122_vm4, %v2587_v13  ;;  %2431 = vmatprep.subr.mxu0 %v2585_v1 }
  0xe3   :  { %2381 = vmatprep.mubr.msk.f32.mxu0 %vm2586_vm0, %v2585_v1  ;;  %2414 = vmatprep.subr.mxu1 %v2585_v1 }
  0xe4   :  { %2432 = vmatpush3.msra.mxu0 %v1037_v22  ;;  %2415 = vmatpush3.msk.msra.mxu1 %vm121_vm12, %v2587_v13 }
  0xe5   :  { %2382 = vmatmul.mubr.f32.gmra.mxu0 %v3622_v26  ;;  %2416 = vmatprep.mubr.msk.f32.mxu1 %vm2586_vm0, %v2585_v1 }
  0xe6   :  { %2433 = vmatprep.subr.mxu0 %v2585_v1  ;;  %2417 = vmatmul.mubr.f32.vlgmr.msra.gmra.mxu1 %v985_v20 }
  0xe7   :  { %2434 = vmatpush3.msra.mxu0 %v1044_v37  ;;  %2466 = vmatprep.subr.mxu1 %v2585_v1 }
  0xe8   :  { %2435 = vmatprep.subr.mxu0 %v2585_v1  ;;  %2467 = vmatpush3.msk.msra.mxu1 %vm136_vm2, %v2587_v13  ;;  %vm3911_vm2 = vcmp.eq.s32.totalorder %v2652_v10, %v3202_v17 }
  0xe9   :  { %2436 = vmatpush3.msra.mxu0 %v1051_v56  ;;  %2468 = vmatprep.subr.mxu1 %v2585_v1 }
  0xea   :  { %2419 = vmatprep.mubr.msk.f32.mxu1 %vm2586_vm0, %v2585_v1  ;;  %2437 = vmatprep.subr.mxu0 %v2585_v1 }
  0xeb   :  { %2469 = vmatpush3.msk.msra.mxu1 %vm135_vm3, %v2587_v13  ;;  %2438 = vmatpush3.msra.mxu0 %v1058_v36  ;;  %vm3912_vm3 = vmmov %vm3910_vm9 }
  0xec   :  { %2420 = vmatmul.mubr.f32.gmra.mxu1 %v995_v61  ;;  %2470 = vmatprep.subr.mxu1 %v2585_v1 }
  0xed   :  { %2439 = vmatprep.subr.mxu0 %v2585_v1  ;;  %2471 = vmatpush3.msk.msra.mxu1 %vm134_vm5, %v2587_v13 }
  0xee   :  { %2440 = vmatpush3.msra.mxu0 %v1065_v24  ;;  %2472 = vmatprep.subr.mxu1 %v2585_v1 }
  0xef   :  { %2422 = vmatprep.mubr.msk.f32.mxu1 %vm2586_vm0, %v2585_v1  ;;  %2441 = vmatprep.subr.mxu0 %v2585_v1 }
  0xf0   :  { %2473 = vmatpush3.msk.msra.mxu1 %vm133_vm6, %v2587_v13  ;;  %2442 = vmatpush3.msra.mxu0 %v1072_v21 }
  0xf1   :  { %2423 = vmatmul.mubr.f32.gmra.mxu1 %v1005_v33  ;;  %2474 = vmatprep.subr.mxu1 %v2585_v1 }
  0xf2   :  { %2443 = vmatprep.subr.mxu0 %v2585_v1  ;;  %2475 = vmatpush3.msk.msra.mxu1 %vm132_vm7, %v2587_v13 }
  0xf3   :  { %2444 = vmatpush3.msra.mxu0 %v1079_v46  ;;  %2476 = vmatprep.subr.mxu1 %v2585_v1 }
  0xf4   :  { %2445 = vmatprep.subr.mxu0 %v2585_v1  ;;  %2477 = vmatpush3.msk.msra.mxu1 %vm131_vm8, %v2587_v13 }
  0xf5   :  { %2446 = vmatpush3.msra.mxu0 %v1086_v16  ;;  %2478 = vmatprep.subr.mxu1 %v2585_v1 }
  0xf6   :  { %2447 = vmatprep.subr.mxu0 %v2585_v1  ;;  %2479 = vmatpush3.msk.msra.mxu1 %vm3911_vm2, %v2587_v13 }
  0xf7   :  { %2448 = vmatpush3.msra.mxu0 %v1093_v53  ;;  %2480 = vmatprep.subr.mxu1 %v2585_v1 }
  0xf8   :  { %2449 = vmatprep.subr.mxu0 %v2585_v1  ;;  %2481 = vmatpush3.msk.msra.mxu1 %vm129_vm11, %v2587_v13 }
  0xf9   :  { %2450 = vmatpush3.msra.mxu0 %v1100_v15  ;;  %2482 = vmatprep.subr.mxu1 %v2585_v1 }
  0xfa   :  { %2451 = vmatprep.subr.mxu0 %v2585_v1  ;;  %2483 = vmatpush3.msk.msra.mxu1 %vm3912_vm3, %v2587_v13 }
  0xfb   :  { %2452 = vmatpush3.msra.mxu0 %v1107_v40  ;;  %2484 = vmatprep.subr.mxu1 %v2585_v1 }
  0xfc   :  { %2453 = vmatprep.subr.mxu0 %v2585_v1  ;;  %2485 = vmatpush3.msk.msra.mxu1 %vm127_vm10, %v2587_v13 }
  0xfd   :  { %2454 = vmatpush3.msra.mxu0 %v1114_v54  ;;  %2486 = vmatprep.subr.mxu1 %v2585_v1 }
  0xfe   :  { %2455 = vmatprep.subr.mxu0 %v2585_v1  ;;  %2487 = vmatpush3.msk.msra.mxu1 %vm126_vm13, %v2587_v13 }
  0xff   :  { %2456 = vmatpush3.msra.mxu0 %v1121_v52  ;;  %2457 = vmatprep.mubr.msk.f32.mxu0 %vm2586_vm0, %v2585_v1 }
 0x100   :  { %2488 = vmatprep.subr.mxu1 %v2585_v1  ;;  %2458 = vmatmul.mubr.f32.vlgmr.msra.gmra.mxu0 %v3442_v41 }
 0x101   :  { %2489 = vmatpush3.msk.msra.mxu1 %vm125_vm14, %v2587_v13  ;;  %2460 = vmatprep.mubr.msk.f32.mxu0 %vm2586_vm0, %v2585_v1 }
 0x102   :  { %2490 = vmatprep.subr.mxu1 %v2585_v1  ;;  %2498 = vmatprep.mubr.msk.f32.mxu1 %vm2586_vm0, %v2585_v1 }
 0x103   :  { %2491 = vmatpush3.msk.msra.mxu1 %vm124_vm15, %v2587_v13  ;;  %v259_v3 = vpop.f32.mrf.mxu0 }
 0x104   :  { %2492 = vmatprep.subr.mxu1 %v2585_v1  ;;  %2461 = vmatmul.mubr.f32.gmra.mxu0 %v3590_v43 }
 0x105   :  { %2493 = vmatpush3.msk.msra.mxu1 %vm123_vm1, %v2587_v13  ;;  %2463 = vmatprep.mubr.msk.f32.mxu0 %vm2586_vm0, %v2585_v1  ;;  %v2049_v4 = vpop.f32.mrf.mxu0 }
 0x106   :  { %2494 = vmatprep.subr.mxu1 %v2585_v1 }
 0x107   :  { %2495 = vmatpush3.msk.msra.mxu1 %vm122_vm4, %v2587_v13 }
 0x108   :  { %2496 = vmatprep.subr.mxu1 %v2585_v1  ;;  %2464 = vmatmul.mubr.f32.gmra.mxu0 %v3604_v59 }
 0x109   :  { %2497 = vmatpush3.msk.msra.mxu1 %vm121_vm12, %v2587_v13 }
 0x10a   :  { %2499 = vmatmul.mubr.f32.vlgmr.msra.gmra.mxu1 %v3442_v41 }
 0x10b   :  { %2501 = vmatprep.mubr.msk.f32.mxu1 %vm2586_vm0, %v2585_v1 }
 0x10d   :  { %v430_v5 = vpop.f32.mrf.mxu1 }
 0x10e   :  { %2502 = vmatmul.mubr.f32.gmra.mxu1 %v3590_v43  ;;  %v431_v6 = vadd.f32 %v430_v5, %v259_v3 }
 0x10f   :  { %2504 = vmatprep.mubr.msk.f32.mxu1 %vm2586_vm0, %v2585_v1  ;;  %v2090_v7 = vpop.f32.mrf.mxu1 }
 0x112   :  { %2505 = vmatmul.mubr.f32.gmra.mxu1 %v3604_v59 }
 0x11c   :  { %v269_v9 = vpop.f32.mrf.mxu0 }
 0x11e   :  { %v2052_v10 = vpop.f32.mrf.mxu0 }
 0x121   :  { %v279_v11 = vpop.f32.mrf.mxu0 }
 0x123   :  { %v2055_v2 = vpop.f32.mrf.mxu0 }
 0x127   :  { %v436_v12 = vpop.f32.mrf.mxu1  ;;  %v546_v13 = vpop.f32.mrf.mxu0 }
 0x128   :  { %v437_v29 = vadd.f32 %v436_v12, %v269_v9  ;;  %v547_v35 = vadd.f32 %v546_v13, %v431_v6 }
 0x129   :  { %v2093_v39 = vpop.f32.mrf.mxu1  ;;  %v2131_v42 = vpop.f32.mrf.mxu0 }
 0x12d   :  { %v442_v49 = vpop.f32.mrf.mxu1  ;;  %v553_v55 = vpop.f32.mrf.mxu0 }
 0x12e   :  { %v443_v17 = vadd.f32 %v442_v49, %v279_v11  ;;  %v554_v19 = vadd.f32 %v553_v55, %v437_v29 }
 0x12f   :  { %v2096_v25 = vpop.f32.mrf.mxu1  ;;  %v2134_v27 = vpop.f32.mrf.mxu0 }
 0x133   :  { %v560_v1 = vpop.f32.mrf.mxu0 }
 0x134   :  { %v561_v28 = vadd.f32 %v560_v1, %v443_v17  ;;  %v649_v34 = vpop.f32.mrf.mxu1 }
 0x135   :  { %v650_v38 = vadd.f32 %v649_v34, %v547_v35  ;;  %v2137_v48 = vpop.f32.mrf.mxu0 }
 0x136   :  { %v2172_v51 = vpop.f32.mrf.mxu1 }
 0x13a   :  { %v657_v57 = vpop.f32.mrf.mxu1 }
 0x13b   :  { %v658_v22 = vadd.f32 %v657_v57, %v554_v19 }
 0x13c   :  { %v2175_v32 = vpop.f32.mrf.mxu1 }
 0x13f   :  { %v665_v37 = vpop.f32.mrf.mxu1 }
 0x140   :  { %v666_v45 = vadd.f32 %v665_v37, %v561_v28 }
 0x141   :  { %v2178_v56 = vpop.f32.mrf.mxu1 }
 0x14e   :  { %v784_v14 = vpop.f32.mrf.mxu0 }
 0x14f   :  { %v785_v36 = vadd.f32 %v784_v14, %v650_v38 }
 0x150   :  { %v2213_v47 = vpop.f32.mrf.mxu0 }
 0x154   :  { %v790_v24 = vpop.f32.mrf.mxu0 }
 0x155   :  { %v791_v41 = vadd.f32 %v790_v24, %v658_v22 }
 0x156   :  { %v2216_v44 = vpop.f32.mrf.mxu0 }
 0x159   :  { %v796_v21 = vpop.f32.mrf.mxu0 }
 0x15a   :  { %v797_v23 = vadd.f32 %v796_v21, %v666_v45  ;;  %v883_v46 = vpop.f32.mrf.mxu1 }
 0x15b   :  { %v884_v58 = vadd.f32 %v883_v46, %v785_v36  ;;  %v2219_v16 = vpop.f32.mrf.mxu0 }
 0x15c   :  { %v2254_v8 = vpop.f32.mrf.mxu1 }
 0x160   :  { %v889_v53 = vpop.f32.mrf.mxu1 }
 0x161   :  { %v890_v60 = vadd.f32 %v889_v53, %v791_v41 }
 0x162   :  { %v2257_v20 = vpop.f32.mrf.mxu1 }
 0x165   :  { %v895_v0 = vpop.f32.mrf.mxu1 }
 0x166   :  { %v896_v15 = vadd.f32 %v895_v0, %v797_v23 }
 0x167   :  { %v2260_v30 = vpop.f32.mrf.mxu1 }
 0x175   :  { %v989_v40 = vpop.f32.mrf.mxu0 }
 0x177   :  { %v2295_v54 = vpop.f32.mrf.mxu0 }
 0x17e   :  { %v1160_v52 = vpop.f32.mrf.mxu1 }
 0x17f   :  { %v1161_v43 = vadd.f32 %v1160_v52, %v989_v40 }
 0x180   :  { %v2336_v31 = vpop.f32.mrf.mxu1 }
 0x18e   :  { %v999_v59 = vpop.f32.mrf.mxu0 }
 0x190   :  { %v2298_v61 = vpop.f32.mrf.mxu0 }
 0x193   :  { %v1009_v26 = vpop.f32.mrf.mxu0 }
 0x195   :  { %v2301_v18 = vpop.f32.mrf.mxu0 }
 0x199   :  { %v1166_v33 = vpop.f32.mrf.mxu1  ;;  %v1276_v62 = vpop.f32.mrf.mxu0 }
 0x19a   :  { %v1277_v49 = vadd.f32 %v1276_v62, %v1161_v43  ;;  %v1167_v17 = vadd.f32 %v1166_v33, %v999_v59 }
 0x19b   :  { %v2339_v63 = vpop.f32.mrf.mxu1  ;;  %v2377_v50 = vpop.f32.mrf.mxu0 }
 0x19f   :  { %v1172_v3 = vpop.f32.mrf.mxu1  ;;  %v1283_v4 = vpop.f32.mrf.mxu0 }
 0x1a0   :  { %v1284_v27 = vadd.f32 %v1283_v4, %v1167_v17  ;;  %v1173_v38 = vadd.f32 %v1172_v3, %v1009_v26 }
 0x1a1   :  { %v2342_v5 = vpop.f32.mrf.mxu1  ;;  %v2380_v6 = vpop.f32.mrf.mxu0 }
 0x1a5   :  { %v1290_v7 = vpop.f32.mrf.mxu0 }
 0x1a6   :  { %v1379_v9 = vpop.f32.mrf.mxu1  ;;  %v1291_v22 = vadd.f32 %v1290_v7, %v1173_v38 }
 0x1a7   :  { %v2383_v10 = vpop.f32.mrf.mxu0  ;;  %v1380_v19 = vadd.f32 %v1379_v9, %v1277_v49 }
 0x1a8   :  { %v2418_v11 = vpop.f32.mrf.mxu1 }
 0x1ac   :  { %v1387_v2 = vpop.f32.mrf.mxu1 }
 0x1ad   :  { %v1388_v48 = vadd.f32 %v1387_v2, %v1284_v27 }
 0x1ae   :  { %v2421_v12 = vpop.f32.mrf.mxu1 }
 0x1b1   :  { %v1395_v13 = vpop.f32.mrf.mxu1 }
 0x1b2   :  { %v1396_v56 = vadd.f32 %v1395_v13, %v1291_v22 }
 0x1b3   :  { %v2424_v29 = vpop.f32.mrf.mxu1 }
 0x1c0   :  { %v1514_v35 = vpop.f32.mrf.mxu0 }
 0x1c1   :  { %v1515_v1 = vadd.f32 %v1514_v35, %v1380_v19 }
 0x1c2   :  { %v2459_v39 = vpop.f32.mrf.mxu0 }
 0x1c4   :  { %v1520_v42 = vpop.f32.mrf.mxu0 }
 0x1c5   :  { %v1521_v32 = vadd.f32 %v1520_v42, %v1388_v48 }
 0x1c6   :  { %v2462_v55 = vpop.f32.mrf.mxu0 }
 0x1c8   :  { %v1526_v25 = vpop.f32.mrf.mxu0 }
 0x1c9   :  { %v1527_v47 = vadd.f32 %v1526_v25, %v1396_v56 }
 0x1ca   :  { %v1613_v28 = vpop.f32.mrf.mxu1  ;;  %v2465_v34 = vpop.f32.mrf.mxu0 }
 0x1cb   :  { %v1614_v51 = vadd.f32 %v1613_v28, %v1515_v1 }
 0x1cc   :  { %v2500_v57 = vpop.f32.mrf.mxu1 }
 0x1cd   :  { %v1629_v37 = vmul.f32 %v1614_v51, %v884_v58 }
 0x1ce   :  { %v1619_v45 = vpop.f32.mrf.mxu1 }
 0x1cf   :  { %v1620_v14 = vadd.f32 %v1619_v45, %v1521_v32 }
 0x1d0   :  { %v2503_v36 = vpop.f32.mrf.mxu1 }
 0x1d1   :  { %v1630_v24 = vmul.f32 %v1620_v14, %v890_v60 }
 0x1d2   :  { %v1625_v41 = vpop.f32.mrf.mxu1 }
 0x1d3   :  { %v1632_v44 = vadd.f32 %v1630_v24, %v1629_v37  ;;  %v1626_v21 = vadd.f32 %v1625_v41, %v1527_v47 }
 0x1d4   :  { %v2506_v23 = vpop.f32.mrf.mxu1 }
 0x1d5   :  { %v1631_v46 = vmul.f32 %v1626_v21, %v896_v15 }
 0x1d7   :  { %v1633_v16 = vadd.f32 %v1632_v44, %v1631_v46 }
 0x1d9   :  { %v1634_v8 = vrot.slane %v1633_v16, 4 }
 0x1db   :  { %v1635_v53 = vadd.f32 %v1634_v8, %v1633_v16 }
 0x1dd   :  { %v1636_v20 = vrot.slane %v1635_v53, 2 }
 0x1df   :  { %v1637_v0 = vadd.f32 %v1636_v20, %v1635_v53 }
 0x1e1   :  { %v1638_v30 = vrot.slane %v1637_v0, 1 }
 0x1e3   :  { %v1639_v58 = vadd.f32 %v1638_v30, %v1637_v0 }
 0x1e5   :  { %1640 = vst [vmem:[#allocation7] sm:$0x1] %v1639_v58 }
 0x1e6   :  { %2566 = shalt.err (!%p2563_p0)
}
 0x1e7   :  { %1650 = dma.vmem_to_hbm [thread:$0]  %s1648_s28, 16, %s3902_s4, [#allocation4]  }
 0x1e8   :  { %2579 = dma.done.wait [#allocation4], 16  }
 0x1e9   :  { %2580 = vsyncadd [#allocation4], 4294967280 }
 0x1ea   :  { %1654 = vsyncpa [#allocation3], 1 }
 0x1eb   :  { %1655 = vsyncpa [#allocation6], 1 }
 0x1ec   :  { %1656 = vsyncpa [#allocation4], 1 }

</bundles_post_ra>
